<compile_context>
chip_gen: v7x
topology: tpu7x:2x2x1
jax: 0.10.0
libtpu: 0.0.40
codegen_flags: <defaults>
</compile_context>

<pallas_src>
import jax
import jax.numpy as jnp
from jax import lax
from jax.experimental import pallas as pl
from jax.experimental.pallas import tpu as pltpu


def _dot_t(a, b):
    """a @ b.T on the MXU without materializing a transpose (contract dim 1 of both)."""
    return lax.dot_general(a, b, (((1,), (1,)), ((), ())),
                           preferred_element_type=jnp.float32)


def _rnn_fc_logsoftmax_kernel(tok_ref,      # VMEM (S*B, 1) int32 token ids, row = t*B + b
                              emb_ref,      # VMEM (V, H)  nn.Embedding.weight
                              wih_ref,      # VMEM (H, H)  nn.RNN.weight_ih_l0   (out,in)
                              whh_ref,      # VMEM (H, H)  nn.RNN.weight_hh_l0   (out,in)
                              bih_ref,      # VMEM (1, H)  nn.RNN.bias_ih_l0
                              bhh_ref,      # VMEM (1, H)  nn.RNN.bias_hh_l0
                              h0_ref,       # VMEM (B, H)  initial hidden (layer 0)
                              wfc_ref,      # VMEM (O, H)  nn.Linear.weight       (out,in)
                              bfc_ref,      # VMEM (1, O)  nn.Linear.bias
                              logp_ref,     # out VMEM (B, O) log-probs
                              hn_ref):      # out VMEM (B, H) final hidden
    SB = tok_ref.shape[0]
    V, H = emb_ref.shape
    B = h0_ref.shape[0]
    S = SB // B

    # ---------------- one-time prep (off the serial critical path) --------------------
    # Fused per-token input contribution: fused[v] = E[v] @ W_ih^T + (b_ih + b_hh).
    fused = _dot_t(emb_ref[...], wih_ref[...]) + bih_ref[...] + bhh_ref[...]        # (V, H)

    # Embedding gather + input projection as ONE one-hot MXU matmul:
    #   xs_all[t*B + b] = fused[token[b, t]]
    tok = tok_ref[...]                                                              # (S*B, 1)
    lanes = lax.broadcasted_iota(jnp.int32, (SB, V), dimension=1)                   # (S*B, V)
    onehot = (lanes == tok).astype(jnp.float32)                                     # (S*B, V)
    xs_all = jnp.dot(onehot, fused, preferred_element_type=jnp.float32)             # (S*B, H)

    # ---------------- serial recurrence: h = tanh(x_t + h @ W_hh^T) -------------------
    whh = whh_ref[...]
    h = h0_ref[...].astype(jnp.float32)
    for t in range(S):           # S small & static -> unrolled; use fori_loop if S grows
        x_t = xs_all[t * B:(t + 1) * B, :]                                          # (B, H)
        h = jnp.tanh(x_t + _dot_t(h, whh))
    hn_ref[...] = h.astype(hn_ref.dtype)

    # ---------------- fc + LogSoftmax(dim=1) ------------------------------------------
    logits = _dot_t(h, wfc_ref[...]) + bfc_ref[...]                                 # (B, O)
    m = jnp.max(logits, axis=-1, keepdims=True)
    lse = jnp.log(jnp.sum(jnp.exp(logits - m), axis=-1, keepdims=True)) + m
    logp_ref[...] = (logits - lse).astype(logp_ref.dtype)


@jax.jit
def simple_rnn_forward(tokens, hidden, params):
    """tokens: int32 (B, S); hidden: (num_layers=1, B, H).
       Returns (log_probs (B, O), hidden (1, B, H)) matching the PyTorch module."""
    B, S = tokens.shape
    V, H = params["embedding"].shape
    O = params["w_fc"].shape[0]

    vmem = pl.BlockSpec(memory_space=pltpu.MemorySpace.VMEM)

    # Tiny O(B*S) int relayout so the one-hot rows come out in t*B+b order; everything
    # heavy (gather, projections, recurrence, softmax) lives in the kernel.
    tok_col = tokens.astype(jnp.int32).T.reshape(S * B, 1)

    logp, hn = pl.pallas_call(
        _rnn_fc_logsoftmax_kernel,
        out_shape=(
            jax.ShapeDtypeStruct((B, O), jnp.float32),
            jax.ShapeDtypeStruct((B, H), jnp.float32),
        ),
        in_specs=[vmem] * 9,
        out_specs=(vmem, vmem),
        # Grid-less on purpose: at B=2, S=8, H=32 the kernel is latency-bound; a batch
        # grid axis (dimension_semantics=("parallel",)) only pays off at much larger B.
    )(tok_col,
      params["embedding"],
      params["w_ih"],
      params["w_hh"],
      params["b_ih"][None, :],      # free reshape only -- no transposes / gathers
      params["b_hh"][None, :],
      hidden[0],
      params["w_fc"],
      params["b_fc"][None, :])

    return logp, hn[None]           # hidden back to (1, B, H)


def _reference_forward(tokens, hidden, params):
    """Pure-JAX reference matching PyTorch SimpleRNN.forward."""
    x = params["embedding"][tokens]                                  # (B, S, H)
    h = hidden[0]
    for t in range(tokens.shape[1]):
        h = jnp.tanh(x[:, t] @ params["w_ih"].T + params["b_ih"]
                     + h @ params["w_hh"].T + params["b_hh"])
    logits = h @ params["w_fc"].T + params["b_fc"]
    return jax.nn.log_softmax(logits, axis=-1), h[None]


def init_params(key, input_size, hidden_size, output_size):
    ks = jax.random.split(key, 7)
    s = 1.0 / jnp.sqrt(hidden_size)
    return {
        # nn.Embedding: N(0, 1)
        "embedding": jax.random.normal(ks[0], (input_size, hidden_size), jnp.float32),
        # nn.RNN layer 0: U(-1/sqrt(H), 1/sqrt(H))
        "w_ih": jax.random.uniform(ks[1], (hidden_size, hidden_size), jnp.float32, -s, s),
        "w_hh": jax.random.uniform(ks[2], (hidden_size, hidden_size), jnp.float32, -s, s),
        "b_ih": jax.random.uniform(ks[3], (hidden_size,), jnp.float32, -s, s),
        "b_hh": jax.random.uniform(ks[4], (hidden_size,), jnp.float32, -s, s),
        # nn.Linear(H, O)
        "w_fc": jax.random.uniform(ks[5], (output_size, hidden_size), jnp.float32, -s, s),
        "b_fc": jax.random.uniform(ks[6], (output_size,), jnp.float32, -s, s),
    }


if __name__ == "__main__":
    input_size = 16    # vocab
    hidden_size = 32
    output_size = 10
    batch = 2
    seq = 8

    key = jax.random.PRNGKey(0)
    pkey, tkey = jax.random.split(key)
    params = init_params(pkey, input_size, hidden_size, output_size)

    tokens = jax.random.randint(tkey, (batch, seq), 0, input_size, dtype=jnp.int32)
    h0 = jnp.zeros((1, batch, hidden_size), jnp.float32)             # initHidden (per-batch)

    log_probs, hidden = simple_rnn_forward(tokens, h0, params)
    jax.block_until_ready((log_probs, hidden))

    assert log_probs.shape == (batch, output_size)
    assert hidden.shape == (1, batch, hidden_size)

    ref_logp, ref_hidden = _reference_forward(tokens, h0, params)
    assert jnp.allclose(log_probs, ref_logp, atol=1e-3, rtol=1e-3)
    assert jnp.allclose(hidden, ref_hidden, atol=1e-3, rtol=1e-3)

    print("KERNEL_OK")
</pallas_src>

<mosaic_0001>
module attributes {stable_mosaic.version = 11 : i64} {
  func.func @_rnn_fc_logsoftmax_kernel(%arg0: memref<16x1xi32, #tpu.memory_space<vmem>>, %arg1: memref<16x32xf32, #tpu.memory_space<vmem>>, %arg2: memref<32x32xf32, #tpu.memory_space<vmem>>, %arg3: memref<32x32xf32, #tpu.memory_space<vmem>>, %arg4: memref<1x32xf32, #tpu.memory_space<vmem>>, %arg5: memref<1x32xf32, #tpu.memory_space<vmem>>, %arg6: memref<2x32xf32, #tpu.memory_space<vmem>>, %arg7: memref<10x32xf32, #tpu.memory_space<vmem>>, %arg8: memref<1x10xf32, #tpu.memory_space<vmem>>, %arg9: memref<2x10xf32, #tpu.memory_space<vmem>>, %arg10: memref<2x32xf32, #tpu.memory_space<vmem>>) attributes {dimension_semantics = [], scalar_prefetch = 0 : i64, scratch_operands = 0 : i64, tpu.core_type = #tpu.core_type<tc>} {
    %c0 = arith.constant 0 : index
    %c0_0 = arith.constant 0 : index
    %0 = vector.load %arg1[%c0, %c0_0] : memref<16x32xf32, #tpu.memory_space<vmem>>, vector<16x32xf32>
    %c0_1 = arith.constant 0 : index
    %c0_2 = arith.constant 0 : index
    %1 = vector.load %arg2[%c0_1, %c0_2] : memref<32x32xf32, #tpu.memory_space<vmem>>, vector<32x32xf32>
    %cst = arith.constant dense<0.000000e+00> : vector<16x32xf32>
    %2 = tpu.matmul %0, %1, %cst {dimension_numbers = #tpu.dot_dimension_numbers<[1], [1], [0], [0], [0, 0, 1, 0], [], []>} : vector<16x32xf32>, vector<32x32xf32>, vector<16x32xf32> -> vector<16x32xf32>
    %c0_3 = arith.constant 0 : index
    %c0_4 = arith.constant 0 : index
    %3 = vector.load %arg4[%c0_3, %c0_4] : memref<1x32xf32, #tpu.memory_space<vmem>>, vector<1x32xf32>
    %4 = vector.broadcast %3 : vector<1x32xf32> to vector<16x32xf32>
    %5 = arith.addf %2, %4 : vector<16x32xf32>
    %c0_5 = arith.constant 0 : index
    %c0_6 = arith.constant 0 : index
    %6 = vector.load %arg5[%c0_5, %c0_6] : memref<1x32xf32, #tpu.memory_space<vmem>>, vector<1x32xf32>
    %7 = vector.broadcast %6 : vector<1x32xf32> to vector<16x32xf32>
    %8 = arith.addf %5, %7 : vector<16x32xf32>
    %c0_7 = arith.constant 0 : index
    %c0_8 = arith.constant 0 : index
    %9 = vector.load %arg0[%c0_7, %c0_8] : memref<16x1xi32, #tpu.memory_space<vmem>>, vector<16x1xi32>
    %10 = tpu.iota {dimensions = array<i32: 1>} : vector<16x16xi32>
    %11 = vector.broadcast %9 : vector<16x1xi32> to vector<16x16xi32>
    %12 = arith.cmpi eq, %10, %11 : vector<16x16xi32>
    %13 = arith.extui %12 : vector<16x16xi1> to vector<16x16xi32>
    %14 = arith.sitofp %13 : vector<16x16xi32> to vector<16x16xf32>
    %cst_9 = arith.constant dense<0.000000e+00> : vector<16x32xf32>
    %15 = tpu.matmul %14, %8, %cst_9 {dimension_numbers = #tpu.dot_dimension_numbers<[1], [0], [0], [1], [0, 0, 1, 1], [], []>} : vector<16x16xf32>, vector<16x32xf32>, vector<16x32xf32> -> vector<16x32xf32>
    %c0_10 = arith.constant 0 : index
    %c0_11 = arith.constant 0 : index
    %16 = vector.load %arg3[%c0_10, %c0_11] : memref<32x32xf32, #tpu.memory_space<vmem>>, vector<32x32xf32>
    %c0_12 = arith.constant 0 : index
    %c0_13 = arith.constant 0 : index
    %17 = vector.load %arg6[%c0_12, %c0_13] : memref<2x32xf32, #tpu.memory_space<vmem>>, vector<2x32xf32>
    %18 = vector.extract_strided_slice %15 {offsets = [0, 0], sizes = [2, 32], strides = [1, 1]} : vector<16x32xf32> to vector<2x32xf32>
    %cst_14 = arith.constant dense<0.000000e+00> : vector<2x32xf32>
    %19 = tpu.matmul %17, %16, %cst_14 {dimension_numbers = #tpu.dot_dimension_numbers<[1], [1], [0], [0], [0, 0, 1, 0], [], []>} : vector<2x32xf32>, vector<32x32xf32>, vector<2x32xf32> -> vector<2x32xf32>
    %20 = arith.addf %18, %19 : vector<2x32xf32>
    %21 = math.tanh %20 : vector<2x32xf32>
    %22 = vector.extract_strided_slice %15 {offsets = [2, 0], sizes = [2, 32], strides = [1, 1]} : vector<16x32xf32> to vector<2x32xf32>
    %cst_15 = arith.constant dense<0.000000e+00> : vector<2x32xf32>
    %23 = tpu.matmul %21, %16, %cst_15 {dimension_numbers = #tpu.dot_dimension_numbers<[1], [1], [0], [0], [0, 0, 1, 0], [], []>} : vector<2x32xf32>, vector<32x32xf32>, vector<2x32xf32> -> vector<2x32xf32>
    %24 = arith.addf %22, %23 : vector<2x32xf32>
    %25 = math.tanh %24 : vector<2x32xf32>
    %26 = vector.extract_strided_slice %15 {offsets = [4, 0], sizes = [2, 32], strides = [1, 1]} : vector<16x32xf32> to vector<2x32xf32>
    %cst_16 = arith.constant dense<0.000000e+00> : vector<2x32xf32>
    %27 = tpu.matmul %25, %16, %cst_16 {dimension_numbers = #tpu.dot_dimension_numbers<[1], [1], [0], [0], [0, 0, 1, 0], [], []>} : vector<2x32xf32>, vector<32x32xf32>, vector<2x32xf32> -> vector<2x32xf32>
    %28 = arith.addf %26, %27 : vector<2x32xf32>
    %29 = math.tanh %28 : vector<2x32xf32>
    %30 = vector.extract_strided_slice %15 {offsets = [6, 0], sizes = [2, 32], strides = [1, 1]} : vector<16x32xf32> to vector<2x32xf32>
    %cst_17 = arith.constant dense<0.000000e+00> : vector<2x32xf32>
    %31 = tpu.matmul %29, %16, %cst_17 {dimension_numbers = #tpu.dot_dimension_numbers<[1], [1], [0], [0], [0, 0, 1, 0], [], []>} : vector<2x32xf32>, vector<32x32xf32>, vector<2x32xf32> -> vector<2x32xf32>
    %32 = arith.addf %30, %31 : vector<2x32xf32>
    %33 = math.tanh %32 : vector<2x32xf32>
    %34 = vector.extract_strided_slice %15 {offsets = [8, 0], sizes = [2, 32], strides = [1, 1]} : vector<16x32xf32> to vector<2x32xf32>
    %cst_18 = arith.constant dense<0.000000e+00> : vector<2x32xf32>
    %35 = tpu.matmul %33, %16, %cst_18 {dimension_numbers = #tpu.dot_dimension_numbers<[1], [1], [0], [0], [0, 0, 1, 0], [], []>} : vector<2x32xf32>, vector<32x32xf32>, vector<2x32xf32> -> vector<2x32xf32>
    %36 = arith.addf %34, %35 : vector<2x32xf32>
    %37 = math.tanh %36 : vector<2x32xf32>
    %38 = vector.extract_strided_slice %15 {offsets = [10, 0], sizes = [2, 32], strides = [1, 1]} : vector<16x32xf32> to vector<2x32xf32>
    %cst_19 = arith.constant dense<0.000000e+00> : vector<2x32xf32>
    %39 = tpu.matmul %37, %16, %cst_19 {dimension_numbers = #tpu.dot_dimension_numbers<[1], [1], [0], [0], [0, 0, 1, 0], [], []>} : vector<2x32xf32>, vector<32x32xf32>, vector<2x32xf32> -> vector<2x32xf32>
    %40 = arith.addf %38, %39 : vector<2x32xf32>
    %41 = math.tanh %40 : vector<2x32xf32>
    %42 = vector.extract_strided_slice %15 {offsets = [12, 0], sizes = [2, 32], strides = [1, 1]} : vector<16x32xf32> to vector<2x32xf32>
    %cst_20 = arith.constant dense<0.000000e+00> : vector<2x32xf32>
    %43 = tpu.matmul %41, %16, %cst_20 {dimension_numbers = #tpu.dot_dimension_numbers<[1], [1], [0], [0], [0, 0, 1, 0], [], []>} : vector<2x32xf32>, vector<32x32xf32>, vector<2x32xf32> -> vector<2x32xf32>
    %44 = arith.addf %42, %43 : vector<2x32xf32>
    %45 = math.tanh %44 : vector<2x32xf32>
    %46 = vector.extract_strided_slice %15 {offsets = [14, 0], sizes = [2, 32], strides = [1, 1]} : vector<16x32xf32> to vector<2x32xf32>
    %cst_21 = arith.constant dense<0.000000e+00> : vector<2x32xf32>
    %47 = tpu.matmul %45, %16, %cst_21 {dimension_numbers = #tpu.dot_dimension_numbers<[1], [1], [0], [0], [0, 0, 1, 0], [], []>} : vector<2x32xf32>, vector<32x32xf32>, vector<2x32xf32> -> vector<2x32xf32>
    %48 = arith.addf %46, %47 : vector<2x32xf32>
    %49 = math.tanh %48 : vector<2x32xf32>
    %c0_22 = arith.constant 0 : index
    %c0_23 = arith.constant 0 : index
    %50 = vector.load %arg10[%c0_22, %c0_23] : memref<2x32xf32, #tpu.memory_space<vmem>>, vector<2x32xf32>
    tpu.vector_store %arg10[%c0_22, %c0_23], %49 {strides = array<i32>} : memref<2x32xf32, #tpu.memory_space<vmem>>, vector<2x32xf32>,
    %c0_24 = arith.constant 0 : index
    %c0_25 = arith.constant 0 : index
    %51 = vector.load %arg7[%c0_24, %c0_25] : memref<10x32xf32, #tpu.memory_space<vmem>>, vector<10x32xf32>
    %cst_26 = arith.constant dense<0.000000e+00> : vector<2x10xf32>
    %52 = tpu.matmul %49, %51, %cst_26 {dimension_numbers = #tpu.dot_dimension_numbers<[1], [1], [0], [0], [0, 0, 1, 0], [], []>} : vector<2x32xf32>, vector<10x32xf32>, vector<2x10xf32> -> vector<2x10xf32>
    %c0_27 = arith.constant 0 : index
    %c0_28 = arith.constant 0 : index
    %53 = vector.load %arg8[%c0_27, %c0_28] : memref<1x10xf32, #tpu.memory_space<vmem>>, vector<1x10xf32>
    %54 = vector.broadcast %53 : vector<1x10xf32> to vector<2x10xf32>
    %55 = arith.addf %52, %54 : vector<2x10xf32>
    %cst_29 = arith.constant dense<0xFF800000> : vector<2xf32>
    %56 = vector.multi_reduction <maximumf>, %55, %cst_29 [1] : vector<2x10xf32> to vector<2xf32>
    %57 = vector.shape_cast %56 : vector<2xf32> to vector<2x1xf32>
    %58 = vector.broadcast %57 : vector<2x1xf32> to vector<2x10xf32>
    %59 = arith.subf %55, %58 : vector<2x10xf32>
    %60 = math.exp %59 : vector<2x10xf32>
    %cst_30 = arith.constant dense<0.000000e+00> : vector<2xf32>
    %61 = vector.multi_reduction <add>, %60, %cst_30 [1] : vector<2x10xf32> to vector<2xf32>
    %62 = vector.shape_cast %61 : vector<2xf32> to vector<2x1xf32>
    %63 = math.log %62 : vector<2x1xf32>
    %64 = arith.addf %63, %57 : vector<2x1xf32>
    %65 = vector.broadcast %64 : vector<2x1xf32> to vector<2x10xf32>
    %66 = arith.subf %55, %65 : vector<2x10xf32>
    %c0_31 = arith.constant 0 : index
    %c0_32 = arith.constant 0 : index
    %67 = vector.load %arg9[%c0_31, %c0_32] : memref<2x10xf32, #tpu.memory_space<vmem>>, vector<2x10xf32>
    tpu.vector_store %arg9[%c0_31, %c0_32], %66 {strides = array<i32>} : memref<2x10xf32, #tpu.memory_space<vmem>>, vector<2x10xf32>,
    return
  }
}

</mosaic_0001>

<bundles_post_ra>
// kernel: simple_rnn_forward.1
= control target key start
LH: loop header
LB: loop body
LE: loop exit
PB: predicated region body
PF: predicated region fallthrough
CT: control target
= control target key end

     0   :  { %16 = vsyncpa [#allocation3], 0  ;;  %s1905_s0 = inlined_call_operand.vmem [shape: s32[16,1], index: 0, kind: input, shape index: {}]   ;;  %s1906_s1 = inlined_call_operand.hbm [shape: f32[16,32], index: 1, kind: input, shape index: {}]   ;;  %s1907_s2 = inlined_call_operand.vmem [shape: f32[32,32], index: 2, kind: input, shape index: {}]   ;;  %s1908_s3 = inlined_call_operand.vmem [shape: f32[32,32], index: 3, kind: input, shape index: {}]   ;;  %s1909_s4 = inlined_call_operand.vmem [shape: f32[1,32], index: 4, kind: input, shape index: {}]   ;;  %s1910_s5 = inlined_call_operand.hbm [shape: f32[1,32], index: 5, kind: input, shape index: {}]   ;;  %s1911_s6 = inlined_call_operand.hbm [shape: f32[2,32], index: 6, kind: input, shape index: {}]   ;;  %s1912_s7 = inlined_call_operand.hbm [shape: f32[10,32], index: 7, kind: input, shape index: {}]   ;;  %s1913_s8 = inlined_call_operand.hbm [shape: f32[1,10], index: 8, kind: input, shape index: {}]   ;;  %s1914_s9 = inlined_call_operand.hbm [shape: f32[2,10], index: 9, kind: output, shape index: {0}]   ;;  %s1915_s10 = inlined_call_operand.hbm [shape: f32[2,32], index: 10, kind: output, shape index: {1}]  }
   0x1   :  { %17 = vsyncpa [#allocation6], 0 }
   0x2   :  { %18 = vsyncpa [#allocation9], 0 }
   0x3   :  { %19 = vsyncpa [#allocation4], 0 }
   0x4   :  { %20 = vsyncpa [#allocation13], 0  ;;  %s1593_s13 = smov [#allocation5]   ;;  %s1429_s17 = scalar_lea.hbm %s1910_s5, 16 }
   0x5   :  { %s47_s14 = sshll.u32 %s1593_s13, 4  ;;  %p1430_p0 = scmp.ne.s32.totalorder %s1910_s5, %s1429_s17  ;;  %s48_s14 = int_to_ptr.vmem [resolvable:$true] %s47_s14 }
   0x6   :  { %p1433_p1 = scmp.lt.u32.totalorder %s1429_s17, %s1910_s5 }
   0x8   :  { %p1435_p2 = pnand %p1433_p1, %p1430_p0 }
   0xa   :  { %1438 = shalt.err (!%p1435_p2)
}
   0xb   :  { %s1439_s22 = scalar_lea.vmem %s48_s14, 16  ;;  %s1443_s23 = scalar_lea.vmem %s48_s14, 32 }
   0xc   :  { %p1440_p3 = scmp.ne.s32.totalorder %s48_s14, %s1439_s22  ;;  %p1444_p4 = scmp.lt.s32.totalorder %s48_s14, %s48_s14 }
   0xd   :  { %p1445_p5 = scmp.lt.s32.totalorder %s1443_s23, %s1439_s22 }
   0xf   :  { %p1446_p6 = por %p1445_p5, %p1444_p4 }
  0x11   :  { %p1447_p7 = pnand %p1446_p6, %p1440_p3 }
  0x13   :  { %1450 = shalt.err (!%p1447_p7)
}
  0x14   :  { %50 = dma.hbm_to_vmem [thread:$0]  %s1910_s5, 16, %s48_s14, [#allocation6]  }
  0x15   :  { %s1594_s26 = smov [#allocation8]   ;;  %s1595_s28 = smov [#allocation2]  }
  0x16   :  { %s66_s27 = sshll.u32 %s1594_s26, 4  ;;  %s28_s29 = sshll.u32 %s1595_s28, 4  ;;  %s67_s27 = int_to_ptr.vmem [resolvable:$true] %s66_s27  ;;  %s29_s29 = int_to_ptr.vmem [resolvable:$true] %s28_s29 }
  0x17   :  { %s1451_s12 = scalar_lea.hbm %s1912_s7, 256 }
  0x18   :  { %p1452_p8 = scmp.ne.s32.totalorder %s1912_s7, %s1451_s12  ;;  %p1455_p9 = scmp.lt.u32.totalorder %s1451_s12, %s1912_s7 }
  0x1a   :  { %p1457_p10 = pnand %p1455_p9, %p1452_p8 }
  0x1c   :  { %1460 = shalt.err (!%p1457_p10)
}
  0x1d   :  { %s1461_s5 = scalar_lea.vmem %s67_s27, 256  ;;  %p1466_p12 = scmp.lt.s32.totalorder %s67_s27, %s67_s27 }
  0x1e   :  { %p1462_p11 = scmp.ne.s32.totalorder %s67_s27, %s1461_s5  ;;  %p1467_p13 = scmp.lt.s32.totalorder %s1461_s5, %s1461_s5 }
  0x20   :  { %p1468_p0 = por %p1467_p13, %p1466_p12 }
  0x22   :  { %p1469_p1 = pnand %p1468_p0, %p1462_p11 }
  0x24   :  { %1472 = shalt.err (!%p1469_p1)
}
  0x25   :  { %s1596_s14 = smov 128   ;;  %s1597_s18 = smov 8  }
  0x26   :  { %72 = dma.hbm_to_vmem [thread:$0]  %s1912_s7, 256, %s67_s27, [#allocation9], %s1596_s14, %s1596_s14, %s1597_s18  }
  0x27   :  { %s1473_s23 = scalar_lea.hbm %s1906_s1, 256 }
  0x28   :  { %p1474_p2 = scmp.ne.s32.totalorder %s1906_s1, %s1473_s23  ;;  %p1477_p3 = scmp.lt.u32.totalorder %s1473_s23, %s1906_s1 }
  0x2a   :  { %p1479_p4 = pnand %p1477_p3, %p1474_p2 }
  0x2c   :  { %1482 = shalt.err (!%p1479_p4)
}
  0x2d   :  { %s1483_s30 = scalar_lea.vmem %s29_s29, 256  ;;  %p1488_p6 = scmp.lt.s32.totalorder %s29_s29, %s29_s29 }
  0x2e   :  { %p1484_p5 = scmp.ne.s32.totalorder %s29_s29, %s1483_s30  ;;  %p1489_p7 = scmp.lt.s32.totalorder %s1483_s30, %s1483_s30 }
  0x30   :  { %p1490_p8 = por %p1489_p7, %p1488_p6 }
  0x32   :  { %p1491_p9 = pnand %p1490_p8, %p1484_p5 }
  0x34   :  { %1494 = shalt.err (!%p1491_p9)
}
  0x35   :  { %34 = dma.hbm_to_vmem [thread:$0]  %s1906_s1, 256, %s29_s29, [#allocation3], %s1596_s14, %s1596_s14, %s1597_s18  }
  0x36   :  { %s1598_s11 = smov [#allocation7]   ;;  %s1599_s13 = smov [#allocation10]  }
  0x37   :  { %s57_s12 = sshll.u32 %s1598_s11, 4  ;;  %s79_s15 = sshll.u32 %s1599_s13, 4  ;;  %s58_s12 = int_to_ptr.vmem [resolvable:$true] %s57_s12  ;;  %s80_s15 = int_to_ptr.vmem [resolvable:$true] %s79_s15 }
  0x38   :  { %s1495_s5 = scalar_lea.hbm %s1911_s6, 32 }
  0x39   :  { %p1496_p10 = scmp.ne.s32.totalorder %s1911_s6, %s1495_s5  ;;  %p1499_p11 = scmp.lt.u32.totalorder %s1495_s5, %s1911_s6 }
  0x3b   :  { %p1501_p12 = pnand %p1499_p11, %p1496_p10 }
  0x3d   :  { %1504 = shalt.err (!%p1501_p12)
}
  0x3e   :  { %s1505_s1 = scalar_lea.vmem %s58_s12, 32  ;;  %p1510_p0 = scmp.lt.s32.totalorder %s58_s12, %s58_s12 }
  0x3f   :  { %p1506_p13 = scmp.ne.s32.totalorder %s58_s12, %s1505_s1  ;;  %p1511_p1 = scmp.lt.s32.totalorder %s1505_s1, %s1505_s1 }
  0x41   :  { %p1512_p2 = por %p1511_p1, %p1510_p0 }
  0x43   :  { %p1513_p3 = pnand %p1512_p2, %p1506_p13 }
  0x45   :  { %1516 = shalt.err (!%p1513_p3)
}
  0x46   :  { %60 = dma.hbm_to_vmem [thread:$0]  %s1911_s6, 32, %s58_s12, [#allocation6]  }
  0x47   :  { %s1517_s24 = scalar_lea.hbm %s1913_s8, 16 }
  0x48   :  { %p1518_p4 = scmp.ne.s32.totalorder %s1913_s8, %s1517_s24  ;;  %p1521_p5 = scmp.lt.u32.totalorder %s1517_s24, %s1913_s8 }
  0x4a   :  { %p1523_p6 = pnand %p1521_p5, %p1518_p4 }
  0x4c   :  { %1526 = shalt.err (!%p1523_p6)
}
  0x4d   :  { %s1527_s7 = scalar_lea.vmem %s80_s15, 16  ;;  %s1531_s27 = scalar_lea.vmem %s80_s15, 32 }
  0x4e   :  { %p1528_p7 = scmp.ne.s32.totalorder %s80_s15, %s1527_s7  ;;  %p1532_p8 = scmp.lt.s32.totalorder %s80_s15, %s80_s15 }
  0x4f   :  { %p1533_p9 = scmp.lt.s32.totalorder %s1531_s27, %s1527_s7 }
  0x51   :  { %p1534_p10 = por %p1533_p9, %p1532_p8 }
  0x53   :  { %p1535_p11 = pnand %p1534_p10, %p1528_p7 }
  0x55   :  { %1538 = shalt.err (!%p1535_p11)
}
  0x56   :  { %82 = dma.hbm_to_vmem [thread:$0]  %s1913_s8, 16, %s80_s15, [#allocation9]  }
  0x57   :  { %1583 = dma.done.wait [#allocation3], 256  }
  0x58   :  { %1584 = vsyncadd [#allocation3], 4294967040 }
  0x59   :  { %1585 = dma.done.wait [#allocation6], 48  }
  0x5a   :  { %1586 = vsyncadd [#allocation6], 4294967248 }
  0x5b   :  { %1587 = dma.done.wait [#allocation9], 272  }
  0x5c   :  { %1588 = vsyncadd [#allocation9], 4294967024  ;;  %v1600_v0 = vmov 0   ;;  %vm111_vm0 = vcmask 261120   ;;  %v100_v2 = vld [vmem:[%s1907_s2] sm:$0xff]  ;;  %v101_v3 = vld [vmem:[%s1907_s2 + $0x8] sm:$0xff]  ;;  %v216_v18 = vlaneseq }
  0x5d   :  { %1408 = vset.pattern.permute.xlu0 %v1600_v0  ;;  %vm1723_vm1 = vmpackc.low %vm111_vm0, %vm111_vm0  ;;  %v102_v4 = vld [vmem:[%s1907_s2 + $0x10] sm:$0xff]  ;;  %v1311_v5 = vpack.c.bf16 %v101_v3, %v100_v2  ;;  %v103_v6 = vld [vmem:[%s1907_s2 + $0x18] sm:$0xff]  ;;  %v1601_v15 = vmov 0.0|0.0   ;;  %vm1602_vm2 = vmmov 0   ;;  %v1603_v21 = vmov 0.0  }
  0x5e   :  { %v98_v7 = vld [vmem:[#allocation2] sm:$0xff]  ;;  %v1317_v8 = vpack.c.bf16 %v103_v6, %v102_v4  ;;  %v215_v10 = vld [vmem:[%s1905_s0 + $0x8] sm:$0xff]  ;;  %v314_v16 = vld [vmem:[%s1908_s3 + $0x10] sm:$0xff]  ;;  %v217_v20 = vand.u32 127, %v216_v18  ;;  %vm230_vm3 = vcmask 130048   ;;  %vm952_vm6 = vcmask 261126  }
  0x5f   :  { %1206 = vmatprep.mubr.msk.f32.mxu0 %vm111_vm0, %v98_v7  ;;  %v214_v9 = vld [vmem:[%s1905_s0] sm:$0xff]  ;;  %1313 = vmatprep.subr.msk.bf16.mxu0 %vm1723_vm1, %v1311_v5  ;;  %v99_v11 = vld [vmem:[#allocation2 + $0x8] sm:$0xff]  ;;  %v315_v17 = vld [vmem:[%s1908_s3 + $0x18] sm:$0xff]  ;;  %vm1043_vm7 = vcmask 74752  }
  0x60   :  { %219 = vperm.xlu0 %1408, %v214_v9   ;;  %1316 = vmatpush3.bf16.xpose.msk.msra.mxu0 %vm1723_vm1, %v1311_v5  ;;  %v312_v12 = vld [vmem:[%s1908_s3] sm:$0xff]  ;;  %v313_v13 = vld [vmem:[%s1908_s3 + $0x8] sm:$0xff]  ;;  %v1774_v19 = vpack.c.bf16 %v315_v17, %v314_v16  ;;  %v1096_v26 = vld [vmem:[#allocation5] ss:$0 sm:$0xff] }
  0x61   :  { %1319 = vmatprep.subr.msk.bf16.mxu0 %vm1723_vm1, %v1317_v8  ;;  %v1761_v14 = vpack.c.bf16 %v313_v13, %v312_v12  ;;  %v1089_v24 = vld [vmem:[%s1909_s4] ss:$0 sm:$0xff]  ;;  %v316_v35 = vld [vmem:[#allocation7] sm:$0x3]  ;;  %v954_v13 = vld [vmem:[#allocation8] sm:$0xff]  ;;  %s1604_s4 = smov [#allocation12]  }
  0x62   :  { %s1074_s28 = sshll.u32 %s1604_s4, 4  ;;  %s1075_s28 = int_to_ptr.vmem [resolvable:$true] %s1074_s28 }
  0x63   :  { %s1539_s30 = scalar_lea.vmem %s1075_s28, 32  ;;  %p1544_p13 = scmp.lt.s32.totalorder %s1075_s28, %s1075_s28 }
  0x64   :  { %222 = vperm.xlu0 %1408, %v215_v10   ;;  %p1540_p12 = scmp.ne.s32.totalorder %s1075_s28, %s1539_s30  ;;  %p1545_p0 = scmp.lt.s32.totalorder %s1539_s30, %s1539_s30 }
  0x66   :  { %p1546_p1 = por %p1545_p0, %p1544_p13 }
  0x68   :  { %1322 = vmatpush3.bf16.xpose.msk.msra.mxu0 %vm1723_vm1, %v1317_v8  ;;  %p1547_p2 = pnand %p1546_p1, %p1540_p12 }
  0x69   :  { %1335 = vmatprep.subr.bf16.mxu0 %v1601_v15 }
  0x6f   :  { %1207 = vmatmul.mubr.msk.f32.vlgmr.msra.gmra.mrb[0].mxu0 %vm111_vm0, %v99_v11 }
  0x70   :  { %1338 = vmatpush3.bf16.xpose.msk.msra.mxu0 %vm1723_vm1, %v1761_v14  ;;  %1235 = vmatprep.mubr.msk.f32.mxu0 %vm1602_vm2, %v1603_v21 }
  0x71   :  { %1339 = vmatprep.subr.bf16.mxu0 %v1601_v15 }
  0x78   :  { %1342 = vmatpush3.bf16.xpose.msk.msra.mxu0 %vm1723_vm1, %v1774_v19 }
  0x79   :  { %1351 = vmatprep.subr.bf16.mxu0 %v1601_v15 }
  0xdf   :  { %v220_v22 = vpop.permute.xlu0 %219 }
  0xe0   :  { %vm224_vm4 = vcmp.eq.s32.totalorder %v217_v20, %v220_v22  ;;  %v1141_v22 = vld [vmem:[#allocation10] ss:$0 sm:$0xff] }
  0xe1   :  { %v1097_v23 = vsel %vm224_vm4, 1.0, %v1603_v21 }
  0xe2   :  { %1213 = vmatprep.mubr.msk.f32.mxu1 %vm230_vm3, %v1097_v23 }
  0xe3   :  { %v223_v31 = vpop.permute.xlu0 %222 }
  0xe4   :  { %vm225_vm5 = vcmp.eq.s32.totalorder %v217_v20, %v223_v31 }
  0xe5   :  { %v1098_v34 = vsel %vm225_vm5, 1.0, %v1603_v21 }
 0x142   :  { %v1208_v25 = vpop.f32.mrb[0].mxu0 }
 0x143   :  { %v202_v27 = vadd.f32 %v1208_v25, %v1089_v24  ;;  %v196_v28 = vpop.f32.mrb[1].mxu0 }
 0x144   :  { %v197_v29 = vadd.f32 %v1089_v24, %v196_v28 }
 0x145   :  { %v213_v30 = vadd.f32 %v1096_v26, %v202_v27 }
 0x146   :  { %v212_v32 = vadd.f32 %v1096_v26, %v197_v29 }
 0x148   :  { %v1323_v33 = vpack.c.bf16 %v213_v30, %v212_v32 }
 0x14a   :  { %1324 = vmatprep.subr.bf16.mxu1 %v1323_v33 }
 0x14b   :  { %1326 = vmatpush3.bf16.msra.mxu1 %v1323_v33 }
 0x14c   :  { %1327 = vmatprep.subr.bf16.mxu1 %v1601_v15 }
 0x14e   :  { %1214 = vmatmul.mubr.msk.f32.vlgmr.msra.gmra.mrb[0].mxu1 %vm230_vm3, %v1098_v34 }
 0x14f   :  { %1224 = vmatprep.mubr.msk.f32.mxu1 %vm1602_vm2, %v1603_v21 }
 0x154   :  { %1330 = vmatpush3.bf16.xpose.msk.msra.mxu1 %vm1723_vm1, %v1761_v14 }
 0x155   :  { %1331 = vmatprep.subr.bf16.mxu1 %v1601_v15 }
 0x15c   :  { %1334 = vmatpush3.bf16.xpose.msk.msra.mxu1 %vm1723_vm1, %v1774_v19 }
 0x15d   :  { %1343 = vmatprep.subr.bf16.mxu1 %v1601_v15 }
 0x163   :  { %1225 = vmatmul.mubr.msk.f32.vlgmr.msra.gmra.mrb[2].mxu1 %vm111_vm0, %v316_v35 }
 0x164   :  { %1346 = vmatpush3.bf16.xpose.msk.msra.mxu1 %vm1723_vm1, %v1761_v14  ;;  %1246 = vmatprep.mubr.msk.f32.mxu1 %vm1602_vm2, %v1603_v21 }
 0x165   :  { %1347 = vmatprep.subr.bf16.mxu1 %v1601_v15 }
 0x16c   :  { %1350 = vmatpush3.bf16.xpose.msk.msra.mxu1 %vm1723_vm1, %v1774_v19 }
 0x16d   :  { %1359 = vmatprep.subr.bf16.mxu1 %v1601_v15 }
 0x221   :  { %v1811_v36 = vpop.f32.mrb[0].mxu1 }
 0x222   :  { %v303_v37 = vpop.f32.mrb[1].mxu1 }
 0x236   :  { %v398_v38 = vpop.f32.mrb[2].mxu1 }
 0x237   :  { %v402_v39 = vadd.f32 %v398_v38, %v303_v37  ;;  %v1226_v40 = vpop.f32.mrb[3].mxu1 }
 0x239   :  { %1409 = vtanh.f32 %v402_v39 }
 0x243   :  { %v1410_v41 = vpop.eup %1409 }
 0x244   :  { %1236 = vmatmul.mubr.msk.f32.vlgmr.msra.gmra.mrb[2].mxu0 %vm111_vm0, %v1410_v41 }
 0x245   :  { %1354 = vmatpush3.bf16.xpose.msk.msra.mxu0 %vm1723_vm1, %v1761_v14  ;;  %1257 = vmatprep.mubr.msk.f32.mxu0 %vm1602_vm2, %v1603_v21 }
 0x246   :  { %1355 = vmatprep.subr.bf16.mxu0 %v1601_v15 }
 0x24d   :  { %1358 = vmatpush3.bf16.xpose.msk.msra.mxu0 %vm1723_vm1, %v1774_v19 }
 0x24e   :  { %1367 = vmatprep.subr.bf16.mxu0 %v1601_v15 }
 0x317   :  { %v473_v42 = vpop.f32.mrb[2].mxu0 }
 0x318   :  { %v478_v43 = vrot.slane %v473_v42, 6  ;;  %v1237_v44 = vpop.f32.mrb[3].mxu0 }
 0x31a   :  { %v480_v45 = vadd.f32 %v478_v43, %v303_v37 }
 0x31c   :  { %1411 = vtanh.f32 %v480_v45 }
 0x326   :  { %v1412_v46 = vpop.eup %1411 }
 0x327   :  { %v483_v47 = vrot.slane %v1412_v46, 2 }
 0x329   :  { %1247 = vmatmul.mubr.msk.f32.vlgmr.msra.gmra.mrb[4].mxu1 %vm111_vm0, %v483_v47 }
 0x32a   :  { %1362 = vmatpush3.bf16.xpose.msk.msra.mxu1 %vm1723_vm1, %v1761_v14  ;;  %1268 = vmatprep.mubr.msk.f32.mxu1 %vm1602_vm2, %v1603_v21 }
 0x32b   :  { %1363 = vmatprep.subr.bf16.mxu1 %v1601_v15 }
 0x332   :  { %1366 = vmatpush3.bf16.xpose.msk.msra.mxu1 %vm1723_vm1, %v1774_v19 }
 0x333   :  { %1375 = vmatprep.subr.bf16.mxu1 %v1601_v15 }
 0x3fc   :  { %v552_v48 = vpop.f32.mrb[4].mxu1 }
 0x3fd   :  { %v557_v49 = vrot.slane %v552_v48, 4  ;;  %v1248_v50 = vpop.f32.mrb[5].mxu1 }
 0x3ff   :  { %v559_v51 = vadd.f32 %v557_v49, %v303_v37 }
 0x401   :  { %1413 = vtanh.f32 %v559_v51 }
 0x40b   :  { %v1414_v52 = vpop.eup %1413 }
 0x40c   :  { %v562_v53 = vrot.slane %v1414_v52, 4 }
 0x40e   :  { %1258 = vmatmul.mubr.msk.f32.vlgmr.msra.gmra.mrb[4].mxu0 %vm111_vm0, %v562_v53 }
 0x40f   :  { %1370 = vmatpush3.bf16.xpose.msk.msra.mxu0 %vm1723_vm1, %v1761_v14  ;;  %1279 = vmatprep.mubr.msk.f32.mxu0 %vm1602_vm2, %v1603_v21 }
 0x410   :  { %1371 = vmatprep.subr.bf16.mxu0 %v1601_v15 }
 0x417   :  { %1374 = vmatpush3.bf16.xpose.msk.msra.mxu0 %vm1723_vm1, %v1774_v19 }
 0x418   :  { %1383 = vmatprep.subr.bf16.mxu0 %v1601_v15 }
 0x4e1   :  { %v631_v54 = vpop.f32.mrb[4].mxu0 }
 0x4e2   :  { %v636_v55 = vrot.slane %v631_v54, 2  ;;  %v1259_v56 = vpop.f32.mrb[5].mxu0 }
 0x4e4   :  { %v638_v57 = vadd.f32 %v636_v55, %v303_v37 }
 0x4e6   :  { %1415 = vtanh.f32 %v638_v57 }
 0x4f0   :  { %v1416_v58 = vpop.eup %1415 }
 0x4f1   :  { %v641_v59 = vrot.slane %v1416_v58, 6 }
 0x4f3   :  { %1269 = vmatmul.mubr.msk.f32.vlgmr.msra.gmra.mrb[6].mxu1 %vm111_vm0, %v641_v59 }
 0x4f4   :  { %1378 = vmatpush3.bf16.xpose.msk.msra.mxu1 %vm1723_vm1, %v1761_v14  ;;  %1290 = vmatprep.mubr.msk.f32.mxu1 %vm1602_vm2, %v1603_v21 }
 0x4f5   :  { %1379 = vmatprep.subr.bf16.mxu1 %v1601_v15 }
 0x4fc   :  { %1382 = vmatpush3.bf16.xpose.msk.msra.mxu1 %vm1723_vm1, %v1774_v19 }
 0x4fd   :  { %1391 = vmatprep.subr.bf16.mxu1 %v1601_v15 }
 0x5c6   :  { %v710_v60 = vpop.f32.mrb[6].mxu1 }
 0x5c7   :  { %v714_v61 = vadd.f32 %v1811_v36, %v710_v60  ;;  %v1270_v62 = vpop.f32.mrb[7].mxu1 }
 0x5c9   :  { %1417 = vtanh.f32 %v714_v61 }
 0x5d3   :  { %v1418_v63 = vpop.eup %1417 }
 0x5d4   :  { %1280 = vmatmul.mubr.msk.f32.vlgmr.msra.gmra.mrb[6].mxu0 %vm111_vm0, %v1418_v63 }
 0x5d5   :  { %1386 = vmatpush3.bf16.xpose.msk.msra.mxu0 %vm1723_vm1, %v1761_v14  ;;  %1301 = vmatprep.mubr.msk.f32.mxu0 %vm1602_vm2, %v1603_v21  ;;  %v955_v14 = vld [vmem:[#allocation8 + $0x8] sm:$0x3] }
 0x5d6   :  { %1387 = vmatprep.subr.bf16.mxu0 %v1601_v15  ;;  %v1392_v15 = vpack.c.bf16 %v955_v14, %v954_v13 }
 0x5dd   :  { %1390 = vmatpush3.bf16.xpose.msk.msra.mxu0 %vm1723_vm1, %v1774_v19 }
 0x6a7   :  { %v785_v0 = vpop.f32.mrb[6].mxu0 }
 0x6a8   :  { %v790_v2 = vrot.slane %v785_v0, 6  ;;  %v1281_v3 = vpop.f32.mrb[7].mxu0 }
 0x6aa   :  { %v792_v4 = vadd.f32 %v1811_v36, %v790_v2 }
 0x6ac   :  { %1419 = vtanh.f32 %v792_v4 }
 0x6b6   :  { %v1420_v5 = vpop.eup %1419 }
 0x6b7   :  { %v795_v6 = vrot.slane %v1420_v5, 2 }
 0x6b9   :  { %1291 = vmatmul.mubr.msk.f32.vlgmr.msra.gmra.mrb[8].mxu1 %vm111_vm0, %v795_v6 }
 0x6ba   :  { %1308 = vmatprep.mubr.msk.f32.mxu1 %vm1602_vm2, %v1603_v21  ;;  %1394 = vmatpush3.bf16.xpose.msk.msra.mxu1 %vm1723_vm1, %v1392_v15 }
 0x78c   :  { %v864_v7 = vpop.f32.mrb[8].mxu1 }
 0x78d   :  { %v869_v8 = vrot.slane %v864_v7, 4  ;;  %v1292_v9 = vpop.f32.mrb[9].mxu1 }
 0x78f   :  { %v871_v10 = vadd.f32 %v1811_v36, %v869_v8 }
 0x791   :  { %1421 = vtanh.f32 %v871_v10 }
 0x79b   :  { %v1422_v11 = vpop.eup %1421 }
 0x79c   :  { %v874_v12 = vrot.slane %v1422_v11, 4 }
 0x79e   :  { %1302 = vmatmul.mubr.msk.f32.vlgmr.msra.gmra.mrb[8].mxu0 %vm111_vm0, %v874_v12 }
 0x871   :  { %v943_v16 = vpop.f32.mrb[8].mxu0 }
 0x872   :  { %v948_v17 = vrot.slane %v943_v16, 2  ;;  %v1303_v18 = vpop.f32.mrb[9].mxu0 }
 0x874   :  { %v950_v19 = vadd.f32 %v1811_v36, %v948_v17 }
 0x876   :  { %1423 = vtanh.f32 %v950_v19 }
 0x880   :  { %v1424_v20 = vpop.eup %1423 }
 0x881   :  { %v964_v21 = vrot.slane %v1424_v20, 6  ;;  %953 = vst.msk [vmem:[#allocation12 - $0x6] sm:$0xc0] %vm952_vm6, %v1424_v20 }
 0x883   :  { %1309 = vmatmul.mubr.msk.f32.vlgmr.msra.gmra.mrb[10].mxu1 %vm111_vm0, %v964_v21 }
 0x956   :  { %v1039_v23 = vpop.f32.mrb[10].mxu1 }
 0x957   :  { %v1040_v24 = vadd.f32 %v1141_v22, %v1039_v23  ;;  %v1310_v25 = vpop.f32.mrb[11].mxu1 }
 0x959   :  { %v1044_v1 = vsel %vm1043_vm7, %v1040_v24, -inf }
 0x95a   :  { %1045 = vmax.xlane.f32.xlu1 %v1044_v1 }
 0x9e7   :  { %v1046_v26 = vpop.xlane.xlu1 %1045 }
 0x9e8   :  { %v1047_v27 = vsub.f32 %v1040_v24, %v1046_v26 }
 0x9ea   :  { %v1048_v28 = vmul.f32 1.442695, %v1047_v27 }
 0x9ec   :  { %1425 = vpow2.f32 %v1048_v28 }
 0x9f6   :  { %v1426_v29 = vpop.eup %1425 }
 0x9f7   :  { %v1050_v30 = vsel %vm1043_vm7, %v1426_v29, 0.0 }
 0x9f8   :  { %1051 = vadd.xlane.f32.xlu1 %v1050_v30 }
 0x9f9   :  { %1550 = shalt.err (!%p1547_p2)
}
 0x9fa   :  { %s1551_s6 = scalar_lea.hbm %s1915_s10, 32 }
 0x9fb   :  { %p1552_p3 = scmp.ne.s32.totalorder %s1915_s10, %s1551_s6  ;;  %p1555_p4 = scmp.lt.u32.totalorder %s1551_s6, %s1915_s10 }
 0x9fd   :  { %p1557_p5 = pnand %p1555_p4, %p1552_p3 }
 0x9ff   :  { %1560 = shalt.err (!%p1557_p5)
}
 0xa00   :  { %1077 = dma.vmem_to_hbm [thread:$0]  %s1075_s28, 32, %s1915_s10, [#allocation13]  }
 0xa01   :  { %s1605_s17 = smov [#allocation11]  }
 0xa02   :  { %s1064_s5 = sshll.u32 %s1605_s17, 4  ;;  %s1065_s5 = int_to_ptr.vmem [resolvable:$true] %s1064_s5 }
 0xa03   :  { %s1561_s19 = scalar_lea.vmem %s1065_s5, 32  ;;  %p1566_p7 = scmp.lt.s32.totalorder %s1065_s5, %s1065_s5 }
 0xa04   :  { %p1562_p6 = scmp.ne.s32.totalorder %s1065_s5, %s1561_s19  ;;  %p1567_p8 = scmp.lt.s32.totalorder %s1561_s19, %s1561_s19 }
 0xa06   :  { %p1568_p9 = por %p1567_p8, %p1566_p7 }
 0xa08   :  { %p1569_p10 = pnand %p1568_p9, %p1562_p6 }
 0xa85   :  { %v1052_v31 = vpop.xlane.xlu1 %1051 }
 0xa86   :  { %1427 = vlog2.f32 %v1052_v31 }
 0xa90   :  { %v1428_v32 = vpop.eup %1427 }
 0xa91   :  { %v1054_v33 = vmul.f32 0.6931472, %v1428_v32 }
 0xa93   :  { %v1055_v34 = vadd.f32 %v1054_v33, %v1046_v26 }
 0xa95   :  { %v1056_v35 = vsub.f32 %v1040_v24, %v1055_v34 }
 0xa97   :  { %1057 = vst.msk [vmem:[#allocation11] sm:$0x3] %vm1043_vm7, %v1056_v35 }
 0xa98   :  { %1572 = shalt.err (!%p1569_p10)
}
 0xa99   :  { %s1573_s21 = scalar_lea.hbm %s1914_s9, 32 }
 0xa9a   :  { %p1574_p11 = scmp.ne.s32.totalorder %s1914_s9, %s1573_s21  ;;  %p1577_p12 = scmp.lt.u32.totalorder %s1573_s21, %s1914_s9 }
 0xa9c   :  { %p1579_p13 = pnand %p1577_p12, %p1574_p11 }
 0xa9e   :  { %1582 = shalt.err (!%p1579_p13)
}
 0xa9f   :  { %1067 = dma.vmem_to_hbm [thread:$0]  %s1065_s5, 32, %s1914_s9, [#allocation4]  }
 0xaa0   :  { %1589 = dma.done.wait [#allocation4], 32  }
 0xaa1   :  { %1590 = vsyncadd [#allocation4], 4294967264 }
 0xaa2   :  { %1591 = dma.done.wait [#allocation13], 32  }
 0xaa3   :  { %1592 = vsyncadd [#allocation13], 4294967264 }
 0xaa4   :  { %1084 = vsyncpa [#allocation3], 1 }
 0xaa5   :  { %1085 = vsyncpa [#allocation6], 1 }
 0xaa6   :  { %1086 = vsyncpa [#allocation9], 1 }
 0xaa7   :  { %1087 = vsyncpa [#allocation4], 1 }
 0xaa8   :  { %1088 = vsyncpa [#allocation13], 1 }

</bundles_post_ra>
